<compile_context>
chip_gen: v6e
topology: v6e:2x2x1
jax: 0.10.0
libtpu: 0.0.40
codegen_flags: <defaults>
</compile_context>

<pallas_src>
import functools

import numpy as np
import jax
import jax.numpy as jnp
from jax.experimental import pallas as pl
from jax.experimental.pallas import tpu as pltpu


# ----------------------------- in-kernel helpers -----------------------------

def _gelu_exact(x):
    # PyTorch default nn.GELU(): 0.5 * x * (1 + erf(x / sqrt(2)))
    return 0.5 * x * (1.0 + jax.lax.erf(x * np.float32(1.0 / np.sqrt(2.0))))


def _layer_norm(x, gamma, beta, eps=1e-5):
    mean = jnp.mean(x, axis=-1, keepdims=True)
    var = jnp.mean((x - mean) ** 2, axis=-1, keepdims=True)
    return (x - mean) * jax.lax.rsqrt(var + eps) * gamma + beta


# ---------------------------------- kernel -----------------------------------

def transformer_block_kernel(x_ref, bias_ref,
                             wqkv_ref, bqkv_ref, wo_ref, bo_ref,
                             g1_ref, b1_ref, mlpw_ref, mlpb_ref,
                             g2_ref, b2_ref, o_ref,
                             *, n_heads, n_mlp_layers):
    # Per grid step (one batch element):
    #   x_ref:    (1, S, H)     activations
    #   bias_ref: (1, S, S)     additive attention bias (already * -1e9)
    #   wqkv_ref: (H, 3H)       packed [Wq*scale | Wk | Wv]
    #   bqkv_ref: (1, 3H)       packed [bq*scale | bk | bv]
    #   wo_ref:   (H, H), mlpw_ref: (L, H, H), mlpb_ref: (L, 1, H)
    _, S, H = x_ref.shape
    hd = H // n_heads

    x = x_ref[0]                                               # (S, H) f32

    # ---- fused QKV projection: one lane-dense (S,H) x (H,3H) MXU dot ----
    qkv = jnp.dot(x, wqkv_ref[...],
                  preferred_element_type=jnp.float32) + bqkv_ref[...]
    q = qkv[:, 0 * H:1 * H]            # 1/sqrt(hd) already folded into Wq,bq
    k = qkv[:, 1 * H:2 * H]
    v = qkv[:, 2 * H:3 * H]

    # ---- heads as a leading batch dim ----
    qh = jnp.transpose(q.reshape(S, n_heads, hd), (1, 0, 2))   # (nh, S, hd)
    kh = jnp.transpose(k.reshape(S, n_heads, hd), (1, 0, 2))
    vh = jnp.transpose(v.reshape(S, n_heads, hd), (1, 0, 2))

    # ---- attention over all heads at once ----
    s = jnp.einsum("hqd,hkd->hqk", qh, kh,
                   preferred_element_type=jnp.float32)          # (nh, S, S)
    s = s + bias_ref[0][None, :, :]        # per-batch additive mask bias
    # Row-max subtraction kept for numerical safety (cheap XLU reduce).
    s = s - jnp.max(s, axis=-1, keepdims=True)
    p = jnp.exp(s)
    denom = jnp.sum(p, axis=-1, keepdims=True)
    ctx = jnp.einsum("hqk,hkd->hqd", p, vh,
                     preferred_element_type=jnp.float32)        # (nh, S, hd)
    ctx = ctx * pl.reciprocal(denom)       # exact; approx=True -> EUP slot
    # TODO(synk): train-mode attention dropout (pltpu.prng_*) not implemented;
    # eval-mode identity matches nn.Dropout at inference.

    # ---- single full-K output projection (no per-head matmuls / head-sum) ----
    ctx2d = jnp.transpose(ctx, (1, 0, 2)).reshape(S, H)         # (S, nh*hd)
    attn = jnp.dot(ctx2d, wo_ref[...],
                   preferred_element_type=jnp.float32) + bo_ref[...]

    # ---- residual + LN1 ----
    h1 = _layer_norm(x + attn, g1_ref[...], b1_ref[...])

    # ---- MLP: n_mlp_layers x (Linear + exact GELU), statically unrolled ----
    y = h1
    for l in range(n_mlp_layers):
        y = jnp.dot(y, mlpw_ref[l],
                    preferred_element_type=jnp.float32) + mlpb_ref[l]
        y = _gelu_exact(y)

    # ---- residual + LN2 ----
    o_ref[0] = _layer_norm(h1 + y, g2_ref[...], b2_ref[...]).astype(o_ref.dtype)


# ------------------------------- pallas wrapper -------------------------------

def presidential_transformer_forward(x, attention_mask, packed,
                                     n_heads, n_mlp_layers):
    """x: [B, S, H] f32; attention_mask: [B, 1, S, S] (1 = masked) or None."""
    B, S, H = x.shape
    L = packed["mlp_w"].shape[0]

    # Small per-batch additive bias (B, S, S); no (B*S)^2 materialization.
    if attention_mask is None:
        bias = jnp.zeros((B, S, S), jnp.float32)
    else:
        bias = (jnp.broadcast_to(attention_mask[:, 0], (B, S, S))
                .astype(jnp.float32) * jnp.float32(-1.0e9))

    kernel = functools.partial(transformer_block_kernel,
                               n_heads=n_heads, n_mlp_layers=n_mlp_layers)

    batch3 = lambda b: (b, 0, 0)      # per-batch blocks
    const2 = lambda b: (0, 0)         # weights: resident across grid steps
    const3 = lambda b: (0, 0, 0)

    out = pl.pallas_call(
        kernel,
        out_shape=jax.ShapeDtypeStruct((B, S, H), jnp.float32),
        grid=(B,),
        in_specs=[
            pl.BlockSpec((1, S, H), batch3),          # x
            pl.BlockSpec((1, S, S), batch3),          # mask bias
            pl.BlockSpec((H, 3 * H), const2),         # wqkv (scale folded)
            pl.BlockSpec((1, 3 * H), const2),         # bqkv
            pl.BlockSpec((H, H), const2),             # wo
            pl.BlockSpec((1, H), const2),             # bo
            pl.BlockSpec((1, H), const2),             # g1
            pl.BlockSpec((1, H), const2),             # b1
            pl.BlockSpec((L, H, H), const3),          # mlp_w
            pl.BlockSpec((L, 1, H), const3),          # mlp_b
            pl.BlockSpec((1, H), const2),             # g2
            pl.BlockSpec((1, H), const2),             # b2
        ],
        out_specs=pl.BlockSpec((1, S, H), batch3),
        compiler_params=pltpu.CompilerParams(
            dimension_semantics=("parallel",)),       # v7x: shard over 2 TCs
    )(x, bias,
      packed["wqkv"], packed["bqkv"], packed["wo"], packed["bo"],
      packed["g1"], packed["b1"], packed["mlp_w"], packed["mlp_b"],
      packed["g2"], packed["b2"])
    return out


# ---------------------------- params + packing glue ----------------------------

def init_params(key, *, hidden, n_heads, n_mlp_layers):
    # Weights stored in math layout [in, out] (equivalent to nn.Linear W.T).
    def nrm(k, shape, scale=0.02):
        return (scale * jax.random.normal(k, shape)).astype(jnp.float32)
    ks = jax.random.split(key, 10)
    return {
        "wq": nrm(ks[0], (hidden, hidden)), "bq": nrm(ks[1], (1, hidden)),
        "wk": nrm(ks[2], (hidden, hidden)), "bk": nrm(ks[3], (1, hidden)),
        "wv": nrm(ks[4], (hidden, hidden)), "bv": nrm(ks[5], (1, hidden)),
        "wo": nrm(ks[6], (hidden, hidden)), "bo": nrm(ks[7], (1, hidden)),
        "g1": jnp.ones((1, hidden), jnp.float32),
        "b1": jnp.zeros((1, hidden), jnp.float32),
        "mlp_w": nrm(ks[8], (n_mlp_layers, hidden, hidden)),
        "mlp_b": nrm(ks[9], (n_mlp_layers, 1, hidden)),
        "g2": jnp.ones((1, hidden), jnp.float32),
        "b2": jnp.zeros((1, hidden), jnp.float32),
    }


def pack_params(raw, n_heads):
    """One-time wrapper-side weight transform: pack QKV to (H, 3H) and fold
    the 1/sqrt(head_dim) softmax scale into Wq/bq (zero per-call cost)."""
    H = raw["wq"].shape[0]
    hd = H // n_heads
    scale = jnp.float32(1.0 / np.sqrt(hd))
    return {
        "wqkv": jnp.concatenate([raw["wq"] * scale, raw["wk"], raw["wv"]],
                                axis=1),                       # (H, 3H)
        "bqkv": jnp.concatenate([raw["bq"] * scale, raw["bk"], raw["bv"]],
                                axis=1),                       # (1, 3H)
        "wo": raw["wo"], "bo": raw["bo"],
        "g1": raw["g1"], "b1": raw["b1"],
        "mlp_w": raw["mlp_w"], "mlp_b": raw["mlp_b"],
        "g2": raw["g2"], "b2": raw["b2"],
    }


# ---------------------------- pure-JAX reference -------------------------------

def ref_forward(raw, x, attention_mask, n_heads, n_mlp_layers):
    B, S, H = x.shape
    hd = H // n_heads

    def ln(t, g, b):
        m = jnp.mean(t, axis=-1, keepdims=True)
        v = jnp.mean((t - m) ** 2, axis=-1, keepdims=True)
        return (t - m) / jnp.sqrt(v + 1e-5) * g + b

    q = x @ raw["wq"] + raw["bq"]
    k = x @ raw["wk"] + raw["bk"]
    v = x @ raw["wv"] + raw["bv"]
    split = lambda t: t.reshape(B, S, n_heads, hd).transpose(0, 2, 1, 3)
    qh, kh, vh = split(q), split(k), split(v)
    scores = jnp.einsum("bhqd,bhkd->bhqk", qh, kh) / np.sqrt(hd)
    if attention_mask is not None:
        scores = scores + attention_mask * (-1e9)
    p = jax.nn.softmax(scores, axis=-1)
    attn = jnp.einsum("bhqk,bhkd->bhqd", p, vh)
    attn = attn.transpose(0, 2, 1, 3).reshape(B, S, H)
    attn = attn @ raw["wo"] + raw["bo"]
    h1 = ln(x + attn, raw["g1"], raw["b1"])
    y = h1
    for l in range(n_mlp_layers):
        y = jax.nn.gelu(y @ raw["mlp_w"][l] + raw["mlp_b"][l], approximate=False)
    return ln(h1 + y, raw["g2"], raw["b2"])


# ----------------------------------- main --------------------------------------

if __name__ == "__main__":
    B, S = 2, 8
    hidden, n_heads, n_mlp_layers = 32, 4, 2

    key = jax.random.PRNGKey(0)
    k_param, k_x = jax.random.split(key)
    raw = init_params(k_param, hidden=hidden, n_heads=n_heads,
                      n_mlp_layers=n_mlp_layers)
    packed = pack_params(raw, n_heads)

    x = jax.random.normal(k_x, (B, S, hidden), jnp.float32)
    # causal mask: 1 = masked, 0 = visible  -> [B, 1, S, S]
    causal = (jnp.arange(S)[None, :] > jnp.arange(S)[:, None]).astype(jnp.float32)
    attention_mask = jnp.broadcast_to(causal, (B, 1, S, S)).astype(jnp.float32)

    out = presidential_transformer_forward(x, attention_mask, packed,
                                           n_heads, n_mlp_layers)
    out = jax.block_until_ready(out)

    ref = ref_forward(raw, x, attention_mask, n_heads, n_mlp_layers)
    np.testing.assert_allclose(np.asarray(out), np.asarray(ref),
                               rtol=2e-5, atol=2e-5)
    assert out.shape == (B, S, hidden)
    print("KERNEL_OK")
</pallas_src>

<mosaic_0001>
module attributes {stable_mosaic.version = 11 : i64} {
  func.func @transformer_block_kernel(%arg0: i32, %arg1: memref<1x8x32xf32, #tpu.memory_space<vmem>>, %arg2: memref<1x8x8xf32, #tpu.memory_space<vmem>>, %arg3: memref<32x96xf32, #tpu.memory_space<vmem>>, %arg4: memref<1x96xf32, #tpu.memory_space<vmem>>, %arg5: memref<32x32xf32, #tpu.memory_space<vmem>>, %arg6: memref<1x32xf32, #tpu.memory_space<vmem>>, %arg7: memref<1x32xf32, #tpu.memory_space<vmem>>, %arg8: memref<1x32xf32, #tpu.memory_space<vmem>>, %arg9: memref<2x32x32xf32, #tpu.memory_space<vmem>>, %arg10: memref<2x1x32xf32, #tpu.memory_space<vmem>>, %arg11: memref<1x32xf32, #tpu.memory_space<vmem>>, %arg12: memref<1x32xf32, #tpu.memory_space<vmem>>, %arg13: memref<1x8x32xf32, #tpu.memory_space<vmem>>) attributes {dimension_semantics = [#tpu.dimension_semantics<parallel>], iteration_bounds = array<i64: 2>, scalar_prefetch = 0 : i64, scratch_operands = 0 : i64, tpu.core_type = #tpu.core_type<tc>, window_params = [{transform_indices = @transform_0, window_bounds = array<i64: 1, 8, 32>}, {transform_indices = @transform_1, window_bounds = array<i64: 1, 8, 8>}, {pipeline_mode = #tpu.pipeline_mode<synchronous>, transform_indices = @transform_2, window_bounds = array<i64: 32, 96>}, {pipeline_mode = #tpu.pipeline_mode<synchronous>, transform_indices = @transform_3, window_bounds = array<i64: 1, 96>}, {pipeline_mode = #tpu.pipeline_mode<synchronous>, transform_indices = @transform_4, window_bounds = array<i64: 32, 32>}, {pipeline_mode = #tpu.pipeline_mode<synchronous>, transform_indices = @transform_5, window_bounds = array<i64: 1, 32>}, {pipeline_mode = #tpu.pipeline_mode<synchronous>, transform_indices = @transform_6, window_bounds = array<i64: 1, 32>}, {pipeline_mode = #tpu.pipeline_mode<synchronous>, transform_indices = @transform_7, window_bounds = array<i64: 1, 32>}, {pipeline_mode = #tpu.pipeline_mode<synchronous>, transform_indices = @transform_8, window_bounds = array<i64: 2, 32, 32>}, {pipeline_mode = #tpu.pipeline_mode<synchronous>, transform_indices = @transform_9, window_bounds = array<i64: 2, 1, 32>}, {pipeline_mode = #tpu.pipeline_mode<synchronous>, transform_indices = @transform_10, window_bounds = array<i64: 1, 32>}, {pipeline_mode = #tpu.pipeline_mode<synchronous>, transform_indices = @transform_11, window_bounds = array<i64: 1, 32>}, {transform_indices = @transform_12, window_bounds = array<i64: 1, 8, 32>}]} {
    %c0 = arith.constant 0 : index
    %c0_0 = arith.constant 0 : index
    %c0_1 = arith.constant 0 : index
    %0 = vector.load %arg1[%c0, %c0_0, %c0_1] : memref<1x8x32xf32, #tpu.memory_space<vmem>>, vector<1x8x32xf32>
    %1 = vector.shape_cast %0 : vector<1x8x32xf32> to vector<8x32xf32>
    %c0_2 = arith.constant 0 : index
    %c0_3 = arith.constant 0 : index
    %2 = vector.load %arg3[%c0_2, %c0_3] : memref<32x96xf32, #tpu.memory_space<vmem>>, vector<32x96xf32>
    %cst = arith.constant dense<0.000000e+00> : vector<8x96xf32>
    %3 = tpu.matmul %1, %2, %cst {dimension_numbers = #tpu.dot_dimension_numbers<[1], [0], [0], [1], [0, 0, 1, 1], [], []>} : vector<8x32xf32>, vector<32x96xf32>, vector<8x96xf32> -> vector<8x96xf32>
    %c0_4 = arith.constant 0 : index
    %c0_5 = arith.constant 0 : index
    %4 = vector.load %arg4[%c0_4, %c0_5] : memref<1x96xf32, #tpu.memory_space<vmem>>, vector<1x96xf32>
    %5 = vector.broadcast %4 : vector<1x96xf32> to vector<8x96xf32>
    %6 = arith.addf %3, %5 : vector<8x96xf32>
    %7 = vector.extract_strided_slice %6 {offsets = [0, 0], sizes = [8, 32], strides = [1, 1]} : vector<8x96xf32> to vector<8x32xf32>
    %8 = vector.extract_strided_slice %6 {offsets = [0, 32], sizes = [8, 32], strides = [1, 1]} : vector<8x96xf32> to vector<8x32xf32>
    %9 = vector.extract_strided_slice %6 {offsets = [0, 64], sizes = [8, 32], strides = [1, 1]} : vector<8x96xf32> to vector<8x32xf32>
    %10 = vector.shape_cast %7 : vector<8x32xf32> to vector<8x4x8xf32>
    %11 = tpu.transpose %10, [1, 0, 2] : vector<8x4x8xf32> -> vector<4x8x8xf32>
    %12 = vector.shape_cast %8 : vector<8x32xf32> to vector<8x4x8xf32>
    %13 = tpu.transpose %12, [1, 0, 2] : vector<8x4x8xf32> -> vector<4x8x8xf32>
    %14 = vector.shape_cast %9 : vector<8x32xf32> to vector<8x4x8xf32>
    %15 = tpu.transpose %14, [1, 0, 2] : vector<8x4x8xf32> -> vector<4x8x8xf32>
    "tpu.trace_start"() <{level = 10 : i32, message = "hqd,hkd->hqk"}> : () -> ()
    %cst_6 = arith.constant dense<0.000000e+00> : vector<4x8x8xf32>
    %16 = tpu.matmul %11, %13, %cst_6 {dimension_numbers = #tpu.dot_dimension_numbers<[2], [2], [1], [1], [0, 0, 0, 1, 1, 1], [0], [0]>} : vector<4x8x8xf32>, vector<4x8x8xf32>, vector<4x8x8xf32> -> vector<4x8x8xf32>
    "tpu.trace_stop"() : () -> ()
    %c0_7 = arith.constant 0 : index
    %c0_8 = arith.constant 0 : index
    %c0_9 = arith.constant 0 : index
    %17 = vector.load %arg2[%c0_7, %c0_8, %c0_9] : memref<1x8x8xf32, #tpu.memory_space<vmem>>, vector<1x8x8xf32>
    %18 = vector.shape_cast %17 : vector<1x8x8xf32> to vector<8x8xf32>
    %19 = vector.shape_cast %18 : vector<8x8xf32> to vector<1x8x8xf32>
    %20 = vector.broadcast %19 : vector<1x8x8xf32> to vector<4x8x8xf32>
    %21 = arith.addf %16, %20 : vector<4x8x8xf32>
    %cst_10 = arith.constant dense<0xFF800000> : vector<4x8xf32>
    %22 = vector.multi_reduction <maximumf>, %21, %cst_10 [2] : vector<4x8x8xf32> to vector<4x8xf32>
    %23 = vector.shape_cast %22 : vector<4x8xf32> to vector<4x8x1xf32>
    %24 = vector.broadcast %23 : vector<4x8x1xf32> to vector<4x8x8xf32>
    %25 = arith.subf %21, %24 : vector<4x8x8xf32>
    %26 = math.exp %25 : vector<4x8x8xf32>
    %cst_11 = arith.constant dense<0.000000e+00> : vector<4x8xf32>
    %27 = vector.multi_reduction <add>, %26, %cst_11 [2] : vector<4x8x8xf32> to vector<4x8xf32>
    %28 = vector.shape_cast %27 : vector<4x8xf32> to vector<4x8x1xf32>
    "tpu.trace_start"() <{level = 10 : i32, message = "hqk,hkd->hqd"}> : () -> ()
    %cst_12 = arith.constant dense<0.000000e+00> : vector<4x8x8xf32>
    %29 = tpu.matmul %26, %15, %cst_12 {dimension_numbers = #tpu.dot_dimension_numbers<[2], [1], [1], [2], [0, 0, 0, 1, 1, 2], [0], [0]>} : vector<4x8x8xf32>, vector<4x8x8xf32>, vector<4x8x8xf32> -> vector<4x8x8xf32>
    "tpu.trace_stop"() : () -> ()
    %30 = tpu.reciprocal %28 : vector<4x8x1xf32> -> vector<4x8x1xf32>
    %31 = vector.broadcast %30 : vector<4x8x1xf32> to vector<4x8x8xf32>
    %32 = arith.mulf %29, %31 : vector<4x8x8xf32>
    %33 = tpu.transpose %32, [1, 0, 2] : vector<4x8x8xf32> -> vector<8x4x8xf32>
    %34 = vector.shape_cast %33 : vector<8x4x8xf32> to vector<8x32xf32>
    %c0_13 = arith.constant 0 : index
    %c0_14 = arith.constant 0 : index
    %35 = vector.load %arg5[%c0_13, %c0_14] : memref<32x32xf32, #tpu.memory_space<vmem>>, vector<32x32xf32>
    %cst_15 = arith.constant dense<0.000000e+00> : vector<8x32xf32>
    %36 = tpu.matmul %34, %35, %cst_15 {dimension_numbers = #tpu.dot_dimension_numbers<[1], [0], [0], [1], [0, 0, 1, 1], [], []>} : vector<8x32xf32>, vector<32x32xf32>, vector<8x32xf32> -> vector<8x32xf32>
    %c0_16 = arith.constant 0 : index
    %c0_17 = arith.constant 0 : index
    %37 = vector.load %arg6[%c0_16, %c0_17] : memref<1x32xf32, #tpu.memory_space<vmem>>, vector<1x32xf32>
    %38 = vector.broadcast %37 : vector<1x32xf32> to vector<8x32xf32>
    %39 = arith.addf %36, %38 : vector<8x32xf32>
    %40 = arith.addf %1, %39 : vector<8x32xf32>
    %c0_18 = arith.constant 0 : index
    %c0_19 = arith.constant 0 : index
    %41 = vector.load %arg7[%c0_18, %c0_19] : memref<1x32xf32, #tpu.memory_space<vmem>>, vector<1x32xf32>
    %c0_20 = arith.constant 0 : index
    %c0_21 = arith.constant 0 : index
    %42 = vector.load %arg8[%c0_20, %c0_21] : memref<1x32xf32, #tpu.memory_space<vmem>>, vector<1x32xf32>
    %cst_22 = arith.constant dense<0.000000e+00> : vector<8xf32>
    %43 = vector.multi_reduction <add>, %40, %cst_22 [1] : vector<8x32xf32> to vector<8xf32>
    %44 = vector.shape_cast %43 : vector<8xf32> to vector<8x1xf32>
    %cst_23 = arith.constant 3.200000e+01 : f32
    %45 = vector.broadcast %cst_23 : f32 to vector<8x1xf32>
    %46 = arith.divf %44, %45 : vector<8x1xf32>
    %47 = vector.broadcast %46 : vector<8x1xf32> to vector<8x32xf32>
    %48 = arith.subf %40, %47 : vector<8x32xf32>
    %49 = arith.mulf %48, %48 : vector<8x32xf32>
    %cst_24 = arith.constant dense<0.000000e+00> : vector<8xf32>
    %50 = vector.multi_reduction <add>, %49, %cst_24 [1] : vector<8x32xf32> to vector<8xf32>
    %51 = vector.shape_cast %50 : vector<8xf32> to vector<8x1xf32>
    %cst_25 = arith.constant 3.200000e+01 : f32
    %52 = vector.broadcast %cst_25 : f32 to vector<8x1xf32>
    %53 = arith.divf %51, %52 : vector<8x1xf32>
    %54 = vector.broadcast %46 : vector<8x1xf32> to vector<8x32xf32>
    %55 = arith.subf %40, %54 : vector<8x32xf32>
    %cst_26 = arith.constant 9.99999974E-6 : f32
    %56 = vector.broadcast %cst_26 : f32 to vector<8x1xf32>
    %57 = arith.addf %53, %56 : vector<8x1xf32>
    %58 = math.rsqrt %57 : vector<8x1xf32>
    %59 = vector.broadcast %58 : vector<8x1xf32> to vector<8x32xf32>
    %60 = arith.mulf %55, %59 : vector<8x32xf32>
    %61 = vector.broadcast %41 : vector<1x32xf32> to vector<8x32xf32>
    %62 = arith.mulf %60, %61 : vector<8x32xf32>
    %63 = vector.broadcast %42 : vector<1x32xf32> to vector<8x32xf32>
    %64 = arith.addf %62, %63 : vector<8x32xf32>
    %c0_27 = arith.constant 0 : index
    %c0_28 = arith.constant 0 : index
    %c0_29 = arith.constant 0 : index
    %65 = vector.load %arg9[%c0_27, %c0_28, %c0_29] : memref<2x32x32xf32, #tpu.memory_space<vmem>>, vector<1x32x32xf32>
    %66 = vector.shape_cast %65 : vector<1x32x32xf32> to vector<32x32xf32>
    %cst_30 = arith.constant dense<0.000000e+00> : vector<8x32xf32>
    %67 = tpu.matmul %64, %66, %cst_30 {dimension_numbers = #tpu.dot_dimension_numbers<[1], [0], [0], [1], [0, 0, 1, 1], [], []>} : vector<8x32xf32>, vector<32x32xf32>, vector<8x32xf32> -> vector<8x32xf32>
    %c0_31 = arith.constant 0 : index
    %c0_32 = arith.constant 0 : index
    %c0_33 = arith.constant 0 : index
    %68 = vector.load %arg10[%c0_31, %c0_32, %c0_33] : memref<2x1x32xf32, #tpu.memory_space<vmem>>, vector<1x1x32xf32>
    %69 = vector.shape_cast %68 : vector<1x1x32xf32> to vector<1x32xf32>
    %70 = vector.broadcast %69 : vector<1x32xf32> to vector<8x32xf32>
    %71 = arith.addf %67, %70 : vector<8x32xf32>
    %cst_34 = arith.constant 5.000000e-01 : f32
    %72 = vector.broadcast %cst_34 : f32 to vector<8x32xf32>
    %73 = arith.mulf %72, %71 : vector<8x32xf32>
    %cst_35 = arith.constant 0.707106769 : f32
    %74 = vector.broadcast %cst_35 : f32 to vector<8x32xf32>
    %75 = arith.mulf %71, %74 : vector<8x32xf32>
    %76 = math.erf %75 : vector<8x32xf32>
    %cst_36 = arith.constant 1.000000e+00 : f32
    %77 = vector.broadcast %cst_36 : f32 to vector<8x32xf32>
    %78 = arith.addf %77, %76 : vector<8x32xf32>
    %79 = arith.mulf %73, %78 : vector<8x32xf32>
    %c1 = arith.constant 1 : index
    %c0_37 = arith.constant 0 : index
    %c0_38 = arith.constant 0 : index
    %80 = vector.load %arg9[%c1, %c0_37, %c0_38] : memref<2x32x32xf32, #tpu.memory_space<vmem>>, vector<1x32x32xf32>
    %81 = vector.shape_cast %80 : vector<1x32x32xf32> to vector<32x32xf32>
    %cst_39 = arith.constant dense<0.000000e+00> : vector<8x32xf32>
    %82 = tpu.matmul %79, %81, %cst_39 {dimension_numbers = #tpu.dot_dimension_numbers<[1], [0], [0], [1], [0, 0, 1, 1], [], []>} : vector<8x32xf32>, vector<32x32xf32>, vector<8x32xf32> -> vector<8x32xf32>
    %c1_40 = arith.constant 1 : index
    %c0_41 = arith.constant 0 : index
    %c0_42 = arith.constant 0 : index
    %83 = vector.load %arg10[%c1_40, %c0_41, %c0_42] : memref<2x1x32xf32, #tpu.memory_space<vmem>>, vector<1x1x32xf32>
    %84 = vector.shape_cast %83 : vector<1x1x32xf32> to vector<1x32xf32>
    %85 = vector.broadcast %84 : vector<1x32xf32> to vector<8x32xf32>
    %86 = arith.addf %82, %85 : vector<8x32xf32>
    %cst_43 = arith.constant 5.000000e-01 : f32
    %87 = vector.broadcast %cst_43 : f32 to vector<8x32xf32>
    %88 = arith.mulf %87, %86 : vector<8x32xf32>
    %cst_44 = arith.constant 0.707106769 : f32
    %89 = vector.broadcast %cst_44 : f32 to vector<8x32xf32>
    %90 = arith.mulf %86, %89 : vector<8x32xf32>
    %91 = math.erf %90 : vector<8x32xf32>
    %cst_45 = arith.constant 1.000000e+00 : f32
    %92 = vector.broadcast %cst_45 : f32 to vector<8x32xf32>
    %93 = arith.addf %92, %91 : vector<8x32xf32>
    %94 = arith.mulf %88, %93 : vector<8x32xf32>
    %95 = arith.addf %64, %94 : vector<8x32xf32>
    %c0_46 = arith.constant 0 : index
    %c0_47 = arith.constant 0 : index
    %96 = vector.load %arg11[%c0_46, %c0_47] : memref<1x32xf32, #tpu.memory_space<vmem>>, vector<1x32xf32>
    %c0_48 = arith.constant 0 : index
    %c0_49 = arith.constant 0 : index
    %97 = vector.load %arg12[%c0_48, %c0_49] : memref<1x32xf32, #tpu.memory_space<vmem>>, vector<1x32xf32>
    %cst_50 = arith.constant dense<0.000000e+00> : vector<8xf32>
    %98 = vector.multi_reduction <add>, %95, %cst_50 [1] : vector<8x32xf32> to vector<8xf32>
    %99 = vector.shape_cast %98 : vector<8xf32> to vector<8x1xf32>
    %cst_51 = arith.constant 3.200000e+01 : f32
    %100 = vector.broadcast %cst_51 : f32 to vector<8x1xf32>
    %101 = arith.divf %99, %100 : vector<8x1xf32>
    %102 = vector.broadcast %101 : vector<8x1xf32> to vector<8x32xf32>
    %103 = arith.subf %95, %102 : vector<8x32xf32>
    %104 = arith.mulf %103, %103 : vector<8x32xf32>
    %cst_52 = arith.constant dense<0.000000e+00> : vector<8xf32>
    %105 = vector.multi_reduction <add>, %104, %cst_52 [1] : vector<8x32xf32> to vector<8xf32>
    %106 = vector.shape_cast %105 : vector<8xf32> to vector<8x1xf32>
    %cst_53 = arith.constant 3.200000e+01 : f32
    %107 = vector.broadcast %cst_53 : f32 to vector<8x1xf32>
    %108 = arith.divf %106, %107 : vector<8x1xf32>
    %109 = vector.broadcast %101 : vector<8x1xf32> to vector<8x32xf32>
    %110 = arith.subf %95, %109 : vector<8x32xf32>
    %cst_54 = arith.constant 9.99999974E-6 : f32
    %111 = vector.broadcast %cst_54 : f32 to vector<8x1xf32>
    %112 = arith.addf %108, %111 : vector<8x1xf32>
    %113 = math.rsqrt %112 : vector<8x1xf32>
    %114 = vector.broadcast %113 : vector<8x1xf32> to vector<8x32xf32>
    %115 = arith.mulf %110, %114 : vector<8x32xf32>
    %116 = vector.broadcast %96 : vector<1x32xf32> to vector<8x32xf32>
    %117 = arith.mulf %115, %116 : vector<8x32xf32>
    %118 = vector.broadcast %97 : vector<1x32xf32> to vector<8x32xf32>
    %119 = arith.addf %117, %118 : vector<8x32xf32>
    %c0_55 = arith.constant 0 : index
    %c0_56 = arith.constant 0 : index
    %c0_57 = arith.constant 0 : index
    %120 = vector.load %arg13[%c0_55, %c0_56, %c0_57] : memref<1x8x32xf32, #tpu.memory_space<vmem>>, vector<1x8x32xf32>
    %121 = vector.shape_cast %120 : vector<1x8x32xf32> to vector<8x32xf32>
    %122 = vector.shape_cast %119 : vector<8x32xf32> to vector<1x8x32xf32>
    tpu.vector_store %arg13[%c0_55, %c0_56, %c0_57], %122 {strides = array<i32>} : memref<1x8x32xf32, #tpu.memory_space<vmem>>, vector<1x8x32xf32>,
    return
  }
  func.func @transform_0(%arg0: i32) -> (i32, i32, i32) {
    %c0_i32 = arith.constant 0 : i32
    %c0_i32_0 = arith.constant 0 : i32
    %c0_i32_1 = arith.constant 0 : i32
    return %arg0, %c0_i32, %c0_i32_0 : i32, i32, i32
  }
  func.func @transform_1(%arg0: i32) -> (i32, i32, i32) {
    %c0_i32 = arith.constant 0 : i32
    %c0_i32_0 = arith.constant 0 : i32
    %c0_i32_1 = arith.constant 0 : i32
    return %arg0, %c0_i32, %c0_i32_0 : i32, i32, i32
  }
  func.func @transform_2(%arg0: i32) -> (i32, i32) {
    %c0_i32 = arith.constant 0 : i32
    %c0_i32_0 = arith.constant 0 : i32
    %c0_i32_1 = arith.constant 0 : i32
    return %c0_i32, %c0_i32_0 : i32, i32
  }
  func.func @transform_3(%arg0: i32) -> (i32, i32) {
    %c0_i32 = arith.constant 0 : i32
    %c0_i32_0 = arith.constant 0 : i32
    %c0_i32_1 = arith.constant 0 : i32
    return %c0_i32, %c0_i32_0 : i32, i32
  }
  func.func @transform_4(%arg0: i32) -> (i32, i32) {
    %c0_i32 = arith.constant 0 : i32
    %c0_i32_0 = arith.constant 0 : i32
    %c0_i32_1 = arith.constant 0 : i32
    return %c0_i32, %c0_i32_0 : i32, i32
  }
  func.func @transform_5(%arg0: i32) -> (i32, i32) {
    %c0_i32 = arith.constant 0 : i32
    %c0_i32_0 = arith.constant 0 : i32
    %c0_i32_1 = arith.constant 0 : i32
    return %c0_i32, %c0_i32_0 : i32, i32
  }
  func.func @transform_6(%arg0: i32) -> (i32, i32) {
    %c0_i32 = arith.constant 0 : i32
    %c0_i32_0 = arith.constant 0 : i32
    %c0_i32_1 = arith.constant 0 : i32
    return %c0_i32, %c0_i32_0 : i32, i32
  }
  func.func @transform_7(%arg0: i32) -> (i32, i32) {
    %c0_i32 = arith.constant 0 : i32
    %c0_i32_0 = arith.constant 0 : i32
    %c0_i32_1 = arith.constant 0 : i32
    return %c0_i32, %c0_i32_0 : i32, i32
  }
  func.func @transform_8(%arg0: i32) -> (i32, i32, i32) {
    %c0_i32 = arith.constant 0 : i32
    %c0_i32_0 = arith.constant 0 : i32
    %c0_i32_1 = arith.constant 0 : i32
    %c0_i32_2 = arith.constant 0 : i32
    return %c0_i32, %c0_i32_0, %c0_i32_1 : i32, i32, i32
  }
  func.func @transform_9(%arg0: i32) -> (i32, i32, i32) {
    %c0_i32 = arith.constant 0 : i32
    %c0_i32_0 = arith.constant 0 : i32
    %c0_i32_1 = arith.constant 0 : i32
    %c0_i32_2 = arith.constant 0 : i32
    return %c0_i32, %c0_i32_0, %c0_i32_1 : i32, i32, i32
  }
  func.func @transform_10(%arg0: i32) -> (i32, i32) {
    %c0_i32 = arith.constant 0 : i32
    %c0_i32_0 = arith.constant 0 : i32
    %c0_i32_1 = arith.constant 0 : i32
    return %c0_i32, %c0_i32_0 : i32, i32
  }
  func.func @transform_11(%arg0: i32) -> (i32, i32) {
    %c0_i32 = arith.constant 0 : i32
    %c0_i32_0 = arith.constant 0 : i32
    %c0_i32_1 = arith.constant 0 : i32
    return %c0_i32, %c0_i32_0 : i32, i32
  }
  func.func @transform_12(%arg0: i32) -> (i32, i32, i32) {
    %c0_i32 = arith.constant 0 : i32
    %c0_i32_0 = arith.constant 0 : i32
    %c0_i32_1 = arith.constant 0 : i32
    return %arg0, %c0_i32, %c0_i32_0 : i32, i32, i32
  }
}

</mosaic_0001>

<bundles_post_ra>
// kernel: tpu_custom_call.1
= control target key start
LH: loop header
LB: loop body
LE: loop exit
PB: predicated region body
PF: predicated region fallthrough
CT: control target
= control target key end

     0   :  { %s3297_s0 = inlined_call_operand.hbm [shape: f32[2,8,32], index: 0, kind: input, shape index: {}]   ;;  %s3298_s1 = inlined_call_operand.hbm [shape: f32[2,8,8], index: 1, kind: input, shape index: {}]   ;;  %s3299_s2 = inlined_call_operand.hbm [shape: f32[32,96], index: 2, kind: input, shape index: {}]   ;;  %s3300_s3 = inlined_call_operand.vmem [shape: f32[1,96], index: 3, kind: input, shape index: {}]   ;;  %s3301_s4 = inlined_call_operand.hbm [shape: f32[32,32], index: 4, kind: input, shape index: {}]   ;;  %s3302_s5 = inlined_call_operand.vmem [shape: f32[1,32], index: 5, kind: input, shape index: {}]   ;;  %s3303_s6 = inlined_call_operand.vmem [shape: f32[1,32], index: 6, kind: input, shape index: {}]   ;;  %s3304_s7 = inlined_call_operand.vmem [shape: f32[1,32], index: 7, kind: input, shape index: {}]   ;;  %s3305_s8 = inlined_call_operand.hbm [shape: f32[2,32,32], index: 8, kind: input, shape index: {}]   ;;  %s3306_s9 = inlined_call_operand.vmem [shape: f32[2,1,32], index: 9, kind: input, shape index: {}]   ;;  %s3307_s10 = inlined_call_operand.vmem [shape: f32[1,32], index: 10, kind: input, shape index: {}]   ;;  %s3308_s11 = inlined_call_operand.vmem [shape: f32[1,32], index: 11, kind: input, shape index: {}]   ;;  %s3309_s12 = inlined_call_operand.hbm [shape: f32[2,8,32], index: 12, kind: output, shape index: {}]  }
   0x1   :  { %3320 = sst [smem:[#allocation22_spill]] %s3299_s2 }
   0x2   :  { %3321 = sst [smem:[#allocation23_spill]] %s3301_s4 }
   0x3   :  { %3322 = sst [smem:[#allocation24_spill]] %s3305_s8 }
   0x4   :  { %3323 = sst [smem:[#allocation25_spill]] %s3309_s12 }
   0x5   :  { %17 = vsyncpa [#allocation3], 0 }
   0x6   :  { %19 = vsyncpa [#allocation3 + $0x1], 0 }
   0x7   :  { %20 = vsyncpa [#allocation6], 0 }
   0x8   :  { %22 = vsyncpa [#allocation6 + $0x1], 0 }
   0x9   :  { %23 = vsyncpa [#allocation9], 0 }
   0xa   :  { %24 = vsyncpa [#allocation4], 0 }
   0xb   :  { %26 = vsyncpa [#allocation4 + $0x1], 0  ;;  %s2884_s21 = smov 0   ;;  %s2886_s22 = smov 0  }
   0xc   :  { %s2888_s23 = smov 0   ;;  %s2890_s24 = smov 0  }
   0xd LB: > { %3324 = sst [smem:[#allocation17_spill]] %s2785_s21  ;;  %s2905_s25 = sadd.s32 4294967295, %s2797_s24   ;;  %s2797_s24 = sphi %s2890_s24, %s3351_s24   ;;  %s2793_s23 = sphi %s2888_s23, %s3353_s23   ;;  %s2789_s22 = sphi %s2886_s22, %s3355_s22   ;;  %s2785_s21 = sphi %s2884_s21, %s3354_s21  }
   0xe   : > { %3325 = sst [smem:[#allocation18_spill]] %s2793_s23  ;;  %s2293_s26 = sadd.s32 4294967294, %s2797_s24  }
   0xf   : > { %p52_p0 = scmp.ne.s32.totalorder %s2789_s22, %s2785_s21  ;;  %p3310_p1 = scmp.eq.s32.totalorder %s2905_s25, 0 }
  0x10   : > { %p318_p3 = scmp.eq.s32.totalorder %s2293_s26, 1  ;;  %p2294_p5 = scmp.ge.s32.totalorder %s2797_s24, 1 }
  0x11   : > { %p2914_p4 = por %p3310_p1, %p52_p0  ;;  %p325_p7 = scmp.lt.s32.totalorder %s2797_s24, 3 }
  0x12   : > { %p2919_p6 = por %p318_p3, %p52_p0  ;;  %s2799_s30 = smov [#allocation7]  }
  0x13   : > { %s3326_s27 = scalar_select %p2914_p4, 1, 0 }
  0x14   : > { %s3327_s28 = scalar_select %p2919_p6, 1, 0 }
  0x15   : > { %p2924_p8 = pnand %p2294_p5, %p325_p7  ;;  %s337_s13 = sshll.u32 %s2799_s30, 4  ;;  %s338_s13 = int_to_ptr.vmem [resolvable:$true] %s337_s13 }
  0x16   : > { %3328 = sst [smem:[#allocation19_spill]] %s3327_s28  ;;  %s2800_s15 = smov [#allocation8]  }
  0x17   : > { %s3329_s29 = scalar_select %p2924_p8, 1, 0 }
  0x18   : > { %p2485_p9 = pneg %p2924_p8  ;;  %s353_s16 = sshll.u32 %s2800_s15, 4  ;;  %s354_s16 = int_to_ptr.vmem [resolvable:$true] %s353_s16 }
  0x19   : > { %s2801_s17 = smov [#allocation10]   ;;  %s2598_s19 = scalar_lea.vmem %s338_s13, 512 }
  0x1a   : > { %p2933_p11 = pnand %p2485_p9, %p3310_p1  ;;  %s375_s18 = sshll.u32 %s2801_s17, 4  ;;  %s376_s18 = int_to_ptr.vmem [resolvable:$true] %s375_s18 }
  0x1b   : > { %p2599_p13 = scmp.ne.s32.totalorder %s338_s13, %s2598_s19  ;;  %p2606_p5 = scmp.lt.s32.totalorder %s338_s13, %s338_s13 }
  0x1c   : > { %p2589_p12 = pneg %p2933_p11  ;;  %p2607_p7 = scmp.lt.s32.totalorder %s2598_s19, %s2598_s19 }
  0x1e   : > { %p2601_p0 = pnand %p2599_p13, %p2589_p12  ;;  %p2608_p9 = por %p2607_p7, %p2606_p5 }
  0x20   : > { %p2602_p3 = pneg %p2601_p0 }
  0x22   : > { %p2609_p10 = pnand %p2608_p9, %p2602_p3 }
  0x24   : > { %2612 = shalt.err (!%p2609_p10)
}
  0x25   : > { %s2802_s20 = smov 128   ;;  %s2803_s26 = smov 8  }
  0x26   : > { %s3331_s2 = sld [smem:[#allocation22_spill]]  ;;  %s2624_s17 = scalar_lea.vmem %s354_s16, 512 }
  0x27   : > { %p2625_p1 = scmp.ne.s32.totalorder %s354_s16, %s2624_s17  ;;  %p2632_p2 = scmp.lt.s32.totalorder %s354_s16, %s354_s16 }
  0x28   : > { %p2633_p6 = scmp.lt.s32.totalorder %s2624_s17, %s2624_s17 }
  0x29   : > { %p2627_p13 = pnand %p2625_p1, %p2589_p12 }
  0x2a   : > { %p2634_p5 = por %p2633_p6, %p2632_p2 }
  0x2b   : > { %p2628_p0 = pneg %p2627_p13 }
  0x2c   : > { %2488 = dma.hbm_to_vmem [thread:$0]  (!%p2933_p11), %s3331_s2, 512, %s338_s13, [#allocation6], %s2802_s20, %s2802_s20, %s2803_s26  }
  0x2d   : > { %p2635_p3 = pnand %p2634_p5, %p2628_p0 }
  0x2f   : > { %2638 = shalt.err (!%p2635_p3)
}
  0x30   : > { %s3332_s4 = sld [smem:[#allocation23_spill]]  ;;  %s2650_s13 = scalar_lea.vmem %s376_s18, 1024 }
  0x31   : > { %p2651_p10 = scmp.ne.s32.totalorder %s376_s18, %s2650_s13  ;;  %p2658_p9 = scmp.lt.s32.totalorder %s376_s18, %s376_s18 }
  0x32   : > { %p2659_p13 = scmp.lt.s32.totalorder %s2650_s13, %s2650_s13 }
  0x33   : > { %p2653_p7 = pnand %p2651_p10, %p2589_p12 }
  0x34   : > { %p2660_p4 = por %p2659_p13, %p2658_p9 }
  0x35   : > { %p2654_p1 = pneg %p2653_p7 }
  0x36   : > { %2491 = dma.hbm_to_vmem [thread:$0]  (!%p2933_p11), %s3332_s4, 512, %s354_s16, [#allocation9], %s2802_s20, %s2802_s20, %s2803_s26  }
  0x37   : > { %p2661_p2 = pnand %p2660_p4, %p2654_p1 }
  0x39   : > { %2664 = shalt.err (!%p2661_p2)
}
  0x3a   : > { %s3333_s8 = sld [smem:[#allocation24_spill]]  ;;  %s2964_s28 = sadd.s32 1, %s2797_s24  }
  0x3b   : > { %3334 = sst [smem:[#allocation20_spill]] %s2964_s28  ;;  %s36_s16 = ssub.s32 %s2797_s24, %s2964_s28 }
  0x3c   : > { %s39_s14 = sadd.s32 1, %s2793_s23  ;;  %p37_p4 = scmp.eq.s32.totalorder %s36_s16, 0 }
  0x3d   : > { %p46_p6 = scmp.ne.s32.totalorder %s2793_s23, %s2789_s22  ;;  %p47_p12 = scmp.eq.s32.totalorder %s2797_s24, 0 }
  0x3e   : > { %p2509_p0 = scmp.lt.s32.totalorder %s2797_s24, 2  ;;  %p3336_p3 = scmp.eq.s32.totalorder %s2905_s25, 1 }
  0x3f   : > { %s2974_s17 = scalar_select %p37_p4, %s2793_s23, %s39_s14  }
  0x40   : > { %2494 = dma.hbm_to_vmem [thread:$0]  (!%p2933_p11), %s3333_s8, 1024, %s376_s18, [#allocation9], %s2802_s20, %s2802_s20, %s2803_s26  }
  0x41   : > { %3335 = sst [smem:[#allocation21_spill]] %s2974_s17  ;;  %p48_p5 = por %p47_p12, %p46_p6 }
  0x42   : > { %p2978_p10 = por %p3336_p3, %p46_p6  ;;  %s398_s13 = sand.u32 1, %s2793_s23  }
  0x43   : > { %s2300_s30 = sshll.u32 %s2797_s24, 7  ;;  %s2984_s18 = sshll.u32 %s398_s13, 3 }
  0x44   : > { %s3337_s19 = scalar_select %p2978_p10, 1, 0 }
  0x45   : > { %s2989_s15 = scalar_lea.hbm %s3297_s0, %s2300_s30  ;;  %s402_s16 = scalar_lea.vmem [#allocation2], %s2984_s18 }
  0x46   : > { %s409_s14 = sshll.u32 %s402_s16, 4  ;;  %p2992_p11 = pnand %p2509_p0, %p48_p5  ;;  %s410_s14 = int_to_ptr.vmem [resolvable:$true] %s409_s14 }
  0x47   : > { %s2999_s17 = scalar_lea.hbm %s3298_s1, %s2300_s30  ;;  %s399_s20 = scalar_lea.sflag [#allocation3], %s398_s13 }
  0x48   : > { %s2665_s26 = scalar_lea.hbm %s2989_s15, 128  ;;  %p2667_p1 = pneg %p2992_p11 }
  0x49   : > { %p2666_p7 = scmp.ne.s32.totalorder %s2989_s15, %s2665_s26  ;;  %s2670_s28 = scalar_lea.hbm %s3297_s0, 256 }
  0x4a   : > { %p2671_p2 = scmp.lt.s32.totalorder %s2989_s15, %s3297_s0  ;;  %p2672_p4 = scmp.lt.s32.totalorder %s2670_s28, %s2665_s26 }
  0x4b   : > { %p2668_p9 = pnand %p2667_p1, %p2666_p7 }
  0x4c   : > { %p2673_p6 = por %p2672_p4, %p2671_p2 }
  0x4d   : > { %p2669_p13 = pneg %p2668_p9 }
  0x4f   : > { %p2674_p12 = pnand %p2673_p6, %p2669_p13 }
  0x51   : > { %2677 = shalt.err (!%p2674_p12)
}
  0x52   : > { %s2678_s4 = scalar_lea.vmem %s410_s14, 128  ;;  %s2804_s8 = smov [#allocation2]  }
  0x53   : > { %p2679_p0 = scmp.ne.s32.totalorder %s410_s14, %s2678_s4  ;;  %s2683_s13 = sshll.u32 %s2804_s8, 4  ;;  %s2684_s13 = int_to_ptr.vmem [resolvable:$false] %s2683_s13 }
  0x54   : > { %s2685_s23 = scalar_lea.vmem %s2684_s13, 256  ;;  %p2686_p7 = scmp.lt.s32.totalorder %s410_s14, %s2684_s13 }
  0x55   : > { %p2681_p5 = pnand %p2679_p0, %p2667_p1  ;;  %p2687_p9 = scmp.lt.s32.totalorder %s2685_s23, %s2678_s4 }
  0x57   : > { %p2682_p3 = pneg %p2681_p5  ;;  %p2688_p10 = por %p2687_p9, %p2686_p7 }
  0x59   : > { %p2689_p8 = pnand %p2688_p10, %p2682_p3 }
  0x5b   : > { %2692 = shalt.err (!%p2689_p8)
}
  0x5c   : > { %2498 = dma.hbm_to_vmem [thread:$0]  (!%p2992_p11), %s2989_s15, 128, %s410_s14, %s399_s20  }
  0x5d   : > { %s416_s12 = sand.u32 1, %s2797_s24   ;;  %s420_s21 = scalar_lea.vmem [#allocation5], %s2984_s18 }
  0x5e   : > { %s427_s28 = sshll.u32 %s420_s21, 4  ;;  %s417_s30 = scalar_lea.sflag [#allocation6], %s416_s12  ;;  %s428_s28 = int_to_ptr.vmem [resolvable:$true] %s427_s28 }
  0x5f   : > { %s2693_s26 = scalar_lea.hbm %s2999_s17, 128  ;;  %s2698_s8 = scalar_lea.hbm %s3298_s1, 256 }
  0x60   : > { %p2694_p13 = scmp.ne.s32.totalorder %s2999_s17, %s2693_s26  ;;  %p2699_p2 = scmp.lt.s32.totalorder %s2999_s17, %s3298_s1 }
  0x61   : > { %p2700_p4 = scmp.lt.s32.totalorder %s2698_s8, %s2693_s26 }
  0x62   : > { %p2696_p8 = pnand %p2694_p13, %p2667_p1 }
  0x63   : > { %p2701_p6 = por %p2700_p4, %p2699_p2 }
  0x64   : > { %p2697_p10 = pneg %p2696_p8 }
  0x66   : > { %p2702_p12 = pnand %p2701_p6, %p2697_p10 }
  0x68   : > { %2705 = shalt.err (!%p2702_p12)
}
  0x69   : > { %s2706_s18 = scalar_lea.vmem %s428_s28, 128  ;;  %s2805_s15 = smov [#allocation5]  }
  0x6a   : > { %p2707_p0 = scmp.ne.s32.totalorder %s428_s28, %s2706_s18  ;;  %s2711_s14 = sshll.u32 %s2805_s15, 4  ;;  %s2712_s14 = int_to_ptr.vmem [resolvable:$false] %s2711_s14 }
  0x6b   : > { %s2713_s20 = scalar_lea.vmem %s2712_s14, 256  ;;  %p2714_p7 = scmp.lt.s32.totalorder %s428_s28, %s2712_s14 }
  0x6c   : > { %p2709_p5 = pnand %p2707_p0, %p2667_p1  ;;  %p2715_p9 = scmp.lt.s32.totalorder %s2713_s20, %s2706_s18 }
  0x6e   : > { %p2710_p3 = pneg %p2709_p5  ;;  %p2716_p13 = por %p2715_p9, %p2714_p7 }
  0x70   : > { %p2717_p8 = pnand %p2716_p13, %p2710_p3 }
  0x72   : > { %2720 = shalt.err (!%p2717_p8)
}
  0x73   : > { %2501 = dma.hbm_to_vmem [thread:$0]  (!%p2992_p11), %s2999_s17, 128, %s428_s28, %s417_s30  }
  0x74   : > { %p3339_p10 = scmp.ne.s32.totalorder %s3329_s29, 0 }
  0x75   : > { %s3044_s12 = sand.u32 (!%p3339_p10), 1, %s2789_s22   ;;  %p3340_p1 = scmp.ne.s32.totalorder (!%p3339_p10), %s3326_s27, 0 }
  0x76   : > { %436 = sbr.rel (%p3339_p10) target bundleno = 2558 (0x9fe), region = 68  ;;  %s3047_s21 = sshll.u32 (!%p3339_p10), %s3044_s12, 3 }
  0x77   : > { %s439_s26 = scalar_lea.sflag (!%p3339_p10), [#allocation3], %s3044_s12  ;;  %s442_s16 = scalar_lea.vmem (!%p3339_p10), [#allocation2], %s3047_s21 }
  0x7b   : > { %2764 = dma.done.wait (%p3340_p1), %s439_s26, 128  }
  0x7c   : > { %2766 = vsyncadd (%p3340_p1), %s439_s26, 4294967168  ;;  %s447_s2 = sand.u32 1, %s2905_s25   ;;  %s451_s17 = scalar_lea.vmem [#allocation5], %s3047_s21 }
  0x7d   : > { %s448_s29 = scalar_lea.sflag [#allocation6], %s447_s2 }
  0x7e   : > { %2768 = dma.done.wait (%p3340_p1), %s448_s29, 128  }
  0x7f   : > { %2770 = vsyncadd (%p3340_p1), %s448_s29, 4294967168  ;;  %p3341_p11 = scmp.eq.s32.totalorder %s2905_s25, 0 }
  0x81   : > { %2772 = dma.done.wait (%p3341_p11), [#allocation6], 512   ;;  %p3342_p2 = pmov %p3341_p11 }
  0x83   : > { %2774 = vsyncadd (%p3342_p2), [#allocation6], 4294966784  ;;  %p3343_p4 = pmov %p3342_p2 }
  0x84   : > { %p3344_p6 = pmov %p3342_p2 }
  0x85   : > { %2776 = dma.done.wait (%p3343_p4), [#allocation9], 1536  }
  0x86   : > { %2778 = vsyncadd (%p3344_p6), [#allocation9], 4294965760  ;;  %v2806_v0 = vmov 0.0   ;;  %vm2807_vm0 = vmmov 0   ;;  %v513_v1 = vld [vmem:[#allocation7 + $0x18] sm:$0xff]  ;;  %v512_v2 = vld [vmem:[#allocation7 + $0x10] sm:$0xff]  ;;  %v610_v15 = vlaneseq }
  0x87   : > { %2383 = vmatprep.subr.mxu0 %v2806_v0  ;;  %2391 = vmatprep.mubr.msk.f32.mxu0 %vm2807_vm0, %v2806_v0  ;;  %v511_v3 = vld [vmem:[#allocation7 + $0x8] sm:$0xff]  ;;  %v510_v4 = vld [vmem:[#allocation7] sm:$0xff]  ;;  %vm521_vm1 = vcmask 261120   ;;  %s2808_s30 = smov 104   ;;  %s2809_s4 = smov 120   ;;  %vm1038_vm2 = vcmask 64512  }
  0x88   : > { %2394 = vmatprep.subr.mxu1 %v2806_v0  ;;  %2396 = vmatprep.mubr.msk.f32.mxu1 %vm2807_vm0, %v2806_v0  ;;  %v3077_v5 = vld [vmem:[%s442_s16] sm:$0xff]  ;;  %s2810_s8 = smov 96   ;;  %s2811_s13 = smov 112   ;;  %v2813_v13 = vmov 1983009808   ;;  %v611_v17 = vshrl.u32 %v610_v15, 7 }
  0x89   : > { %2384 = vmatpush3.msra.mxu0 %v513_v1  ;;  %v2310_v6 = vld [vmem:[%s3300_s3] ss:$0 sm:$0xff]  ;;  %s2812_s23 = smov 64   ;;  %v608_v14 = vunpack.c.l.s4 %v2813_v13  ;;  %v2814_v18 = vmov 1934713408   ;;  %s2815_s18 = smov 16  }
  0x8a   : > { %2385 = vmatprep.subr.mxu0 %v2806_v0  ;;  %v640_v19 = vunpack.c.l.s4 %v2814_v18  ;;  %s2816_s15 = smov 8   ;;  %s2817_s14 = smov 24   ;;  %vm1828_vm3 = vcmask 130048   ;;  %vm1830_vm4 = vcmask 195584  }
  0x8b   : > { %2386 = vmatpush3.msra.mxu0 %v512_v2  ;;  %v609_v16 = vunpack.c.0.s8 %v608_v14  ;;  %s3345_s2 = sld [smem:[#allocation25_spill]]  ;;  %p3346_p0 = scmp.ne.s32.totalorder %s3337_s19, 0 }
  0x8c   : > { %2387 = vmatprep.subr.mxu0 %v2806_v0  ;;  %v641_v25 = vunpack.c.0.s8 %v640_v19  ;;  %s2818_s28 = smov [#allocation11]  }
  0x8d   : > { %2388 = vmatpush3.msra.mxu0 %v511_v3  ;;  %v3098_v22 = vsub.s32 %v609_v16, %v611_v17 }
  0x8e   : > { %2389 = vmatprep.subr.mxu0 %v2806_v0  ;;  %v3106_v30 = vsub.s32 %v641_v25, %v611_v17 }
  0x8f   : > { %2390 = vmatpush3.msra.mxu0 %v510_v4 }
  0x90   : > { %2392 = vmatmul.mubr.msk.f32.vlgmr.msra.gmra.mxu0 %vm521_vm1, %v3077_v5  ;;  %2414 = vmatprep.subr.mxu0 %v2806_v0 }
  0x91   : > { %2416 = vmatprep.mubr.msk.f32.mxu0 %vm2807_vm0, %v2806_v0 }
 0x150   : > { %v591_v7 = vpop.f32.mrf.mxu0 }
 0x151   : > { %v592_v8 = vadd.f32 %v2310_v6, %v591_v7 }
 0x152   : > { %v2393_v9 = vpop.f32.mrf.mxu0 }
 0x153   : > { %602 = vrot.lane.b32.xlu1 %v592_v8, %s2808_s30  ;;  %596 = vrot.lane.b32.xlu0 %v592_v8, %s2809_s4  ;;  %s2725_s30 = sshll.u32 %s2818_s28, 4  ;;  %s2726_s30 = int_to_ptr.vmem [resolvable:$false] %s2725_s30 }
 0x157   : > { %741 = vrot.lane.b32.xlu1 %v592_v8, %s2810_s8  ;;  %599 = vrot.lane.b32.xlu0 %v592_v8, %s2811_s13 }
 0x1c5   : > { %v597_v10 = vpop.permute.xlu0 %596  ;;  %v3088_v11 = vpop.permute.xlu1 %602 }
 0x1c6   : > { %743 = vrot.lane.b32.xlu0 %v597_v10, %s2810_s8  ;;  %v621_v23 = vcombine.low %v597_v10, %v3088_v11  ;;  %v622_v24 = vcombine.high %v597_v10, %v3088_v11 }
 0x1c8   : > { %v629_v28 = vrot.slane %v621_v23, %v3098_v22  ;;  %v636_v29 = vrot.slane %v622_v24, %v3098_v22 }
 0x1c9   : > { %v3090_v12 = vpop.permute.xlu0 %599  ;;  %v742_v31 = vpop.permute.xlu1 %741 }
 0x1ca   : > { %747 = vrot.lane.b32.xlu0 %v3088_v11, %s2810_s8  ;;  %745 = vrot.lane.b32.xlu1 %v3090_v12, %s2810_s8  ;;  %v605_v20 = vcombine.low %v592_v8, %v3090_v12  ;;  %v606_v21 = vcombine.high %v592_v8, %v3090_v12 }
 0x1cc   : > { %v613_v26 = vrot.slane %v605_v20, %v3098_v22  ;;  %v620_v27 = vrot.slane %v606_v21, %v3098_v22 }
 0x1ce   : > { %889 = vrot.lane.b32.xlu0 %v592_v8, %s2812_s23  ;;  %891 = vrot.lane.b32.xlu1 %v597_v10, %s2812_s23  ;;  %v637_v32 = vcombine.low %v613_v26, %v629_v28  ;;  %v638_v33 = vcombine.high %v613_v26, %v629_v28  ;;  %v653_v34 = vcombine.low %v620_v27, %v636_v29 }
 0x1cf   : > { %v654_v35 = vcombine.high %v620_v27, %v636_v29 }
 0x1d0   : > { %v645_v37 = vrot.slane %v637_v32, %v3106_v30  ;;  %v652_v38 = vrot.slane %v638_v33, %v3106_v30  ;;  %v661_v39 = vrot.slane %v653_v34, %v3106_v30 }
 0x1d1   : > { %v668_v40 = vrot.slane %v654_v35, %v3106_v30 }
 0x1d2   : > { %v673_v51 = vcombine.low %v645_v37, %v652_v38  ;;  %v2312_v52 = vcombine.high %v645_v37, %v652_v38 }
 0x1d3   : > { %v689_v53 = vcombine.low %v661_v39, %v668_v40  ;;  %v2313_v54 = vcombine.high %v661_v39, %v668_v40 }
 0x1d4   : > { %v680_v63 = vrot.slane %v673_v51, %v3098_v22  ;;  %v688_v1 = vrot.slane %v2312_v52, %v3098_v22 }
 0x1d5   : > { %v696_v2 = vrot.slane %v689_v53, %v3098_v22  ;;  %v704_v3 = vrot.slane %v2313_v54, %v3098_v22 }
 0x1d6   : > { %v705_v15 = vcombine.low %v680_v63, %v688_v1  ;;  %v706_v27 = vcombine.high %v680_v63, %v688_v1 }
 0x1d7   : > { %v721_v16 = vcombine.low %v696_v2, %v704_v3  ;;  %v722_v28 = vcombine.high %v696_v2, %v704_v3 }
 0x1d8   : > { %v713_v21 = vrot.slane %v705_v15, %v3106_v30  ;;  %v720_v35 = vrot.slane %v706_v27, %v3106_v30 }
 0x1d9   : > { %v729_v23 = vrot.slane %v721_v16, %v3106_v30 }
 0x1db   : > { %v737_v29 = vcombine.low %v713_v21, %v729_v23  ;;  %v738_v34 = vcombine.high %v713_v21, %v729_v23 }
 0x238   : > { %v744_v36 = vpop.permute.xlu0 %743 }
 0x23c   : > { %v746_v41 = vpop.permute.xlu1 %745  ;;  %v748_v42 = vpop.permute.xlu0 %747 }
 0x23d   : > { %v753_v43 = vcombine.low %v742_v31, %v746_v41  ;;  %v754_v44 = vcombine.high %v742_v31, %v746_v41  ;;  %v769_v45 = vcombine.low %v744_v36, %v748_v42  ;;  %v770_v46 = vcombine.high %v744_v36, %v748_v42  ;;  %v1037_v41 = vld [vmem:[%s451_s17] sm:$0xff]  ;;  %s2159_s17 = scalar_lea.sflag [#allocation4], %s3044_s12 }
 0x23e   : > { %v736_v36 = vrot.slane %v722_v28, %v3106_v30 }
 0x23f   : > { %v761_v47 = vrot.slane %v753_v43, %v3098_v22  ;;  %v768_v48 = vrot.slane %v754_v44, %v3098_v22  ;;  %v777_v49 = vrot.slane %v769_v45, %v3098_v22  ;;  %v784_v50 = vrot.slane %v770_v46, %v3098_v22 }
 0x240   : > { %v739_v38 = vcombine.low %v720_v35, %v736_v36  ;;  %v740_v40 = vcombine.high %v720_v35, %v736_v36 }
 0x241   : > { %v785_v55 = vcombine.low %v761_v47, %v777_v49  ;;  %v786_v56 = vcombine.high %v761_v47, %v777_v49  ;;  %v801_v57 = vcombine.low %v768_v48, %v784_v50  ;;  %v802_v58 = vcombine.high %v768_v48, %v784_v50 }
 0x243   : > { %v793_v59 = vrot.slane %v785_v55, %v3106_v30  ;;  %v800_v60 = vrot.slane %v786_v56, %v3106_v30  ;;  %v809_v61 = vrot.slane %v801_v57, %v3106_v30  ;;  %v816_v62 = vrot.slane %v802_v58, %v3106_v30  ;;  %v892_v58 = vpop.permute.xlu1 %891 }
 0x245   : > { %v821_v4 = vcombine.low %v793_v59, %v800_v60  ;;  %v2314_v6 = vcombine.high %v793_v59, %v800_v60  ;;  %v837_v7 = vcombine.low %v809_v61, %v816_v62  ;;  %v2315_v8 = vcombine.high %v809_v61, %v816_v62  ;;  %v890_v59 = vpop.permute.xlu0 %889 }
 0x247   : > { %v828_v9 = vrot.slane %v821_v4, %v3098_v22  ;;  %v836_v10 = vrot.slane %v2314_v6, %v3098_v22  ;;  %v844_v13 = vrot.slane %v837_v7, %v3098_v22  ;;  %v852_v14 = vrot.slane %v2315_v8, %v3098_v22 }
 0x249   : > { %v853_v17 = vcombine.low %v828_v9, %v836_v10  ;;  %v869_v18 = vcombine.low %v844_v13, %v852_v14  ;;  %v854_v24 = vcombine.high %v828_v9, %v836_v10  ;;  %v870_v25 = vcombine.high %v844_v13, %v852_v14 }
 0x24b   : > { %v861_v19 = vrot.slane %v853_v17, %v3106_v30  ;;  %v877_v20 = vrot.slane %v869_v18, %v3106_v30  ;;  %v868_v32 = vrot.slane %v854_v24, %v3106_v30  ;;  %v884_v33 = vrot.slane %v870_v25, %v3106_v30 }
 0x24d   : > { %v885_v26 = vcombine.low %v861_v19, %v877_v20  ;;  %v886_v31 = vcombine.high %v861_v19, %v877_v20  ;;  %v887_v37 = vcombine.low %v868_v32, %v884_v33  ;;  %v888_v39 = vcombine.high %v868_v32, %v884_v33 }
 0x24f   : > { %2395 = vmatpush3.xpose.msk.msra.mxu1 %vm1038_vm2, %v885_v26 }
 0x250   : > { %2399 = vmatprep.subr.mxu1 %v2806_v0 }
 0x252   : > { %2397 = vmatmul.mubr.msk.f32.vlgmr.msra.gmra.mxu1 %vm1038_vm2, %v737_v29 }
 0x253   : > { %2400 = vmatpush3.xpose.msk.msra.mxu1 %vm1038_vm2, %v886_v31  ;;  %2401 = vmatprep.mubr.msk.f32.mxu1 %vm2807_vm0, %v2806_v0 }
 0x254   : > { %2404 = vmatprep.subr.mxu1 %v2806_v0 }
 0x256   : > { %2402 = vmatmul.mubr.msk.f32.vlgmr.msra.gmra.mxu1 %vm1038_vm2, %v738_v34 }
 0x257   : > { %2405 = vmatpush3.xpose.msk.msra.mxu1 %vm1038_vm2, %v887_v37  ;;  %2406 = vmatprep.mubr.msk.f32.mxu1 %vm2807_vm0, %v2806_v0 }
 0x258   : > { %2409 = vmatprep.subr.mxu1 %v2806_v0 }
 0x25a   : > { %2407 = vmatmul.mubr.msk.f32.vlgmr.msra.gmra.mxu1 %vm1038_vm2, %v739_v38 }
 0x25b   : > { %2410 = vmatpush3.xpose.msk.msra.mxu1 %vm1038_vm2, %v888_v39  ;;  %2411 = vmatprep.mubr.msk.f32.mxu1 %vm2807_vm0, %v2806_v0 }
 0x25c   : > { %2419 = vmatprep.subr.mxu1 %v2806_v0 }
 0x25e   : > { %2412 = vmatmul.mubr.msk.f32.vlgmr.msra.gmra.mxu1 %vm1038_vm2, %v740_v40 }
 0x25f   : > { %2421 = vmatprep.mubr.msk.f32.mxu1 %vm2807_vm0, %v2806_v0 }
 0x312   : > { %v1111_v42 = vpop.f32.mrf.mxu1 }
 0x313   : > { %v1112_v43 = vadd.f32 %v1111_v42, %v1037_v41 }
 0x314   : > { %v2398_v44 = vpop.f32.mrf.mxu1 }
 0x315   : > { %v1343_v45 = vsel %vm1038_vm2, %v1112_v43, -inf }
 0x316   : > { %1344 = vmax.xlane.f32.xlu1 %v1343_v45  ;;  %v1187_v46 = vpop.f32.mrf.mxu1 }
 0x317   : > { %v1188_v47 = vadd.f32 %v1187_v46, %v1037_v41 }
 0x318   : > { %v2403_v48 = vpop.f32.mrf.mxu1 }
 0x319   : > { %v1346_v49 = vsel %vm1038_vm2, %v1188_v47, -inf }
 0x31a   : > { %1347 = vmax.xlane.f32.xlu0 %v1346_v49  ;;  %v1263_v50 = vpop.f32.mrf.mxu1 }
 0x31b   : > { %v1264_v51 = vadd.f32 %v1263_v50, %v1037_v41 }
 0x31c   : > { %v2408_v52 = vpop.f32.mrf.mxu1 }
 0x31d   : > { %v1349_v53 = vsel %vm1038_vm2, %v1264_v51, -inf }
 0x31e   : > { %1350 = vmax.xlane.f32.xlu0 %v1349_v53  ;;  %v1339_v54 = vpop.f32.mrf.mxu1 }
 0x31f   : > { %v1340_v55 = vadd.f32 %v1339_v54, %v1037_v41 }
 0x320   : > { %v2413_v56 = vpop.f32.mrf.mxu1 }
 0x321   : > { %v1352_v57 = vsel %vm1038_vm2, %v1340_v55, -inf }
 0x322   : > { %1353 = vmax.xlane.f32.xlu1 %v1352_v57 }
 0x333   : > { %893 = vrot.lane.b32.xlu1 %v3090_v12, %s2812_s23 }
 0x334   : > { %895 = vrot.lane.b32.xlu0 %v3088_v11, %s2812_s23 }
 0x39f   : > { %v1345_v60 = vpop.xlane.xlu1 %1344 }
 0x3a0   : > { %v1355_v61 = vsub.f32 %v1112_v43, %v1345_v60 }
 0x3a2   : > { %v1359_v62 = vmul.f32 1.442695, %v1355_v61 }
 0x3a3   : > { %v1348_v63 = vpop.xlane.xlu0 %1347 }
 0x3a4   : > { %2563 = vpow2.f32 %v1359_v62  ;;  %v1356_v1 = vsub.f32 %v1188_v47, %v1348_v63 }
 0x3a6   : > { %v1361_v2 = vmul.f32 1.442695, %v1356_v1 }
 0x3a7   : > { %v1351_v3 = vpop.xlane.xlu0 %1350 }
 0x3a8   : > { %2565 = vpow2.f32 %v1361_v2  ;;  %v1357_v4 = vsub.f32 %v1264_v51, %v1351_v3 }
 0x3aa   : > { %v1363_v6 = vmul.f32 1.442695, %v1357_v4 }
 0x3ab   : > { %v1354_v7 = vpop.xlane.xlu1 %1353  ;;  %v896_v8 = vpop.permute.xlu0 %895 }
 0x3ac   : > { %2567 = vpow2.f32 %v1363_v6  ;;  %v1358_v12 = vsub.f32 %v1340_v55, %v1354_v7  ;;  %v917_v9 = vcombine.low %v892_v58, %v896_v8  ;;  %v918_v11 = vcombine.high %v892_v58, %v896_v8  ;;  %v1835_v58 = vld [vmem:[#allocation8 + $0x18] sm:$0xff] }
 0x3ae   : > { %v1365_v10 = vmul.f32 1.442695, %v1358_v12  ;;  %v925_v17 = vrot.slane %v917_v9, %v3098_v22  ;;  %v932_v18 = vrot.slane %v918_v11, %v3098_v22 }
 0x3af   : > { %v894_v13 = vpop.permute.xlu1 %893 }
 0x3b0   : > { %2569 = vpow2.f32 %v1365_v10  ;;  %v901_v14 = vcombine.low %v890_v59, %v894_v13  ;;  %v902_v15 = vcombine.high %v890_v59, %v894_v13 }
 0x3b1   : > { %v2564_v16 = vpop.eup %2563 }
 0x3b2   : > { %v909_v19 = vrot.slane %v901_v14, %v3098_v22  ;;  %v916_v20 = vrot.slane %v902_v15, %v3098_v22  ;;  %v1367_v21 = vsel %vm1038_vm2, %v2564_v16, 0.0 }
 0x3b3   : > { %1368 = vadd.xlane.f32.xlu1 %v1367_v21 }
 0x3b4   : > { %v933_v23 = vcombine.low %v909_v19, %v925_v17  ;;  %v934_v24 = vcombine.high %v909_v19, %v925_v17  ;;  %v949_v25 = vcombine.low %v916_v20, %v932_v18  ;;  %v950_v26 = vcombine.high %v916_v20, %v932_v18 }
 0x3b5   : > { %v2566_v27 = vpop.eup %2565 }
 0x3b6   : > { %v941_v28 = vrot.slane %v933_v23, %v3106_v30  ;;  %v948_v29 = vrot.slane %v934_v24, %v3106_v30  ;;  %v957_v31 = vrot.slane %v949_v25, %v3106_v30  ;;  %v964_v32 = vrot.slane %v950_v26, %v3106_v30 }
 0x3b7   : > { %v1370_v33 = vsel %vm1038_vm2, %v2566_v27, 0.0 }
 0x3b8   : > { %v969_v34 = vcombine.low %v941_v28, %v948_v29  ;;  %v2316_v35 = vcombine.high %v941_v28, %v948_v29  ;;  %v985_v36 = vcombine.low %v957_v31, %v964_v32  ;;  %v2317_v37 = vcombine.high %v957_v31, %v964_v32  ;;  %1371 = vadd.xlane.f32.xlu0 %v1370_v33  ;;  %v1834_v31 = vld [vmem:[#allocation8 + $0x10] sm:$0xff]  ;;  %v1833_v32 = vld [vmem:[#allocation8 + $0x8] sm:$0xff] }
 0x3b9   : > { %v2568_v38 = vpop.eup %2567 }
 0x3ba   : > { %v976_v39 = vrot.slane %v969_v34, %v3098_v22  ;;  %v984_v40 = vrot.slane %v2316_v35, %v3098_v22  ;;  %v992_v41 = vrot.slane %v985_v36, %v3098_v22  ;;  %v1000_v42 = vrot.slane %v2317_v37, %v3098_v22 }
 0x3bb   : > { %v1373_v43 = vsel %vm1038_vm2, %v2568_v38, 0.0 }
 0x3bc   : > { %1374 = vadd.xlane.f32.xlu0 %v1373_v43  ;;  %v1001_v44 = vcombine.low %v976_v39, %v984_v40  ;;  %v1017_v45 = vcombine.low %v992_v41, %v1000_v42  ;;  %v1002_v46 = vcombine.high %v976_v39, %v984_v40  ;;  %v1018_v47 = vcombine.high %v992_v41, %v1000_v42  ;;  %v1832_v41 = vld [vmem:[#allocation8] sm:$0xff] }
 0x3bd   : > { %v2570_v48 = vpop.eup %2569 }
 0x3be   : > { %v1376_v49 = vsel %vm1038_vm2, %v2570_v48, 0.0  ;;  %v1009_v50 = vrot.slane %v1001_v44, %v3106_v30  ;;  %v1025_v51 = vrot.slane %v1017_v45, %v3106_v30  ;;  %v1016_v52 = vrot.slane %v1002_v46, %v3106_v30 }
 0x3bf   : > { %1377 = vadd.xlane.f32.xlu1 %v1376_v49  ;;  %v1032_v53 = vrot.slane %v1018_v47, %v3106_v30 }
 0x3c0   : > { %v1033_v54 = vcombine.low %v1009_v50, %v1025_v51  ;;  %v1034_v55 = vcombine.high %v1009_v50, %v1025_v51 }
 0x3c1   : > { %v1035_v56 = vcombine.low %v1016_v52, %v1032_v53  ;;  %v1036_v57 = vcombine.high %v1016_v52, %v1032_v53 }
 0x3c2   : > { %2415 = vmatpush3.msra.mxu0 %v1033_v54  ;;  %2420 = vmatpush3.msra.mxu1 %v1034_v55 }
 0x3c3   : > { %2417 = vmatmul.mubr.msk.f32.vlgmr.msra.gmra.mxu0 %vm1038_vm2, %v2564_v16  ;;  %2422 = vmatmul.mubr.msk.f32.vlgmr.msra.gmra.mxu1 %vm1038_vm2, %v2566_v27 }
 0x3c4   : > { %2424 = vmatprep.subr.mxu0 %v2806_v0  ;;  %2429 = vmatprep.subr.mxu1 %v2806_v0 }
 0x3c5   : > { %2425 = vmatpush3.msra.mxu0 %v1035_v56  ;;  %2430 = vmatpush3.msra.mxu1 %v1036_v57 }
 0x3c6   : > { %2426 = vmatprep.mubr.msk.f32.mxu0 %vm2807_vm0, %v2806_v0  ;;  %2431 = vmatprep.mubr.msk.f32.mxu1 %vm2807_vm0, %v2806_v0 }
 0x3c7   : > { %2427 = vmatmul.mubr.msk.f32.vlgmr.msra.gmra.mxu0 %vm1038_vm2, %v2568_v38  ;;  %2432 = vmatmul.mubr.msk.f32.vlgmr.msra.gmra.mxu1 %vm1038_vm2, %v2570_v48 }
 0x3c8   : > { %2434 = vmatprep.subr.mxu0 %v2806_v0  ;;  %2442 = vmatprep.mubr.msk.f32.mxu0 %vm2807_vm0, %v2806_v0 }
 0x3c9   : > { %2445 = vmatprep.subr.mxu1 %v2806_v0  ;;  %2453 = vmatprep.mubr.msk.f32.mxu1 %vm2807_vm0, %v2806_v0 }
 0x3ca   : > { %2435 = vmatpush3.msra.mxu0 %v1835_v58 }
 0x3cb   : > { %2436 = vmatprep.subr.mxu0 %v2806_v0 }
 0x3cc   : > { %2437 = vmatpush3.msra.mxu0 %v1834_v31 }
 0x3cd   : > { %2438 = vmatprep.subr.mxu0 %v2806_v0 }
 0x3ce   : > { %2439 = vmatpush3.msra.mxu0 %v1833_v32 }
 0x3cf   : > { %2440 = vmatprep.subr.mxu0 %v2806_v0 }
 0x3d0   : > { %2441 = vmatpush3.msra.mxu0 %v1832_v41 }
 0x3d1   : > { %2456 = vmatprep.subr.mxu0 %v2806_v0 }
 0x43c   : > { %v1369_v60 = vpop.xlane.xlu1 %1368 }
 0x43d   : > { %2571 = vrcp.f32 %v1369_v60 }
 0x441   : > { %v1372_v59 = vpop.xlane.xlu0 %1371 }
 0x442   : > { %2573 = vrcp.f32 %v1372_v59 }
 0x445   : > { %v1375_v61 = vpop.xlane.xlu0 %1374 }
 0x446   : > { %2575 = vrcp.f32 %v1375_v61 }
 0x448   : > { %v1378_v62 = vpop.xlane.xlu1 %1377 }
 0x449   : > { %2577 = vrcp.f32 %v1378_v62 }
 0x44a   : > { %v2572_v2 = vpop.eup %2571 }
 0x44f   : > { %v2574_v3 = vpop.eup %2573 }
 0x453   : > { %v2576_v7 = vpop.eup %2575 }
 0x456   : > { %v2578_v8 = vpop.eup %2577 }
 0x483   : > { %v1448_v63 = vpop.f32.mrf.mxu0  ;;  %v1521_v1 = vpop.f32.mrf.mxu1 }
 0x484   : > { %v1675_v10 = vmul.f32 %v2572_v2, %v1448_v63  ;;  %v1676_v11 = vmul.f32 %v2574_v3, %v1521_v1 }
 0x485   : > { %v2418_v4 = vpop.f32.mrf.mxu0  ;;  %v2423_v6 = vpop.f32.mrf.mxu1 }
 0x487   : > { %v1594_v12 = vpop.f32.mrf.mxu0  ;;  %v1667_v9 = vpop.f32.mrf.mxu1 }
 0x488   : > { %v1677_v13 = vmul.f32 %v2576_v7, %v1594_v12  ;;  %v1678_v14 = vmul.f32 %v2578_v8, %v1667_v9 }
 0x489   : > { %v2428_v15 = vpop.f32.mrf.mxu0  ;;  %v2433_v16 = vpop.f32.mrf.mxu1 }
 0x48a   : > { %v1679_v17 = vcombine.low %v1675_v10, %v1677_v13  ;;  %v1680_v18 = vcombine.high %v1675_v10, %v1677_v13  ;;  %v1695_v19 = vcombine.low %v1676_v11, %v1678_v14  ;;  %v1696_v20 = vcombine.high %v1676_v11, %v1678_v14  ;;  %v1950_v10 = vld [vmem:[#allocation10 + $0x18] sm:$0xff]  ;;  %v1949_v11 = vld [vmem:[#allocation10 + $0x10] sm:$0xff]  ;;  %v1948_v13 = vld [vmem:[#allocation10 + $0x8] sm:$0xff] }
 0x48b   : > { %2446 = vmatpush3.msra.mxu1 %v1950_v10 }
 0x48c   : > { %v1687_v21 = vrot.slane %v1679_v17, %v3098_v22  ;;  %v1694_v23 = vrot.slane %v1680_v18, %v3098_v22  ;;  %v1703_v24 = vrot.slane %v1695_v19, %v3098_v22  ;;  %v1710_v25 = vrot.slane %v1696_v20, %v3098_v22  ;;  %2447 = vmatprep.subr.mxu1 %v2806_v0  ;;  %v2334_v18 = vld [vmem:[%s3303_s6] ss:$0 sm:$0xff] }
 0x48d   : > { %2448 = vmatpush3.msra.mxu1 %v1949_v11  ;;  %v2335_v20 = vld [vmem:[%s3304_s7] ss:$0 sm:$0xff] }
 0x48e   : > { %v1711_v26 = vcombine.low %v1687_v21, %v1703_v24  ;;  %v1712_v27 = vcombine.high %v1687_v21, %v1703_v24  ;;  %v1727_v28 = vcombine.low %v1694_v23, %v1710_v25  ;;  %v1728_v29 = vcombine.high %v1694_v23, %v1710_v25  ;;  %2449 = vmatprep.subr.mxu1 %v2806_v0  ;;  %v2040_v24 = vld [vmem:[#allocation10 + $0x38] sm:$0xff]  ;;  %v2039_v25 = vld [vmem:[#allocation10 + $0x30] sm:$0xff] }
 0x48f   : > { %2450 = vmatpush3.msra.mxu1 %v1948_v13 }
 0x490   : > { %v1719_v33 = vrot.slane %v1711_v26, %v3106_v30  ;;  %v1726_v34 = vrot.slane %v1712_v27, %v3106_v30  ;;  %v1735_v35 = vrot.slane %v1727_v28, %v3106_v30  ;;  %v1742_v36 = vrot.slane %v1728_v29, %v3106_v30  ;;  %2451 = vmatprep.subr.mxu1 %v2806_v0  ;;  %v2038_v26 = vld [vmem:[#allocation10 + $0x28] sm:$0xff]  ;;  %v2037_v27 = vld [vmem:[#allocation10 + $0x20] sm:$0xff] }
 0x491   : > { %v2336_v28 = vld [vmem:[%s3306_s9] ss:$0 sm:$0xff] }
 0x492   : > { %v1747_v37 = vcombine.low %v1719_v33, %v1726_v34  ;;  %v2330_v38 = vcombine.high %v1719_v33, %v1726_v34  ;;  %v1763_v39 = vcombine.low %v1735_v35, %v1742_v36  ;;  %v2331_v40 = vcombine.high %v1735_v35, %v1742_v36 }
 0x494   : > { %v1754_v42 = vrot.slane %v1747_v37, %v3098_v22  ;;  %v1762_v43 = vrot.slane %v2330_v38, %v3098_v22  ;;  %v1770_v44 = vrot.slane %v1763_v39, %v3098_v22  ;;  %v1778_v45 = vrot.slane %v2331_v40, %v3098_v22 }
 0x496   : > { %v1780_v46 = vcombine.high %v1754_v42, %v1762_v43  ;;  %v1796_v47 = vcombine.high %v1770_v44, %v1778_v45  ;;  %v1779_v48 = vcombine.low %v1754_v42, %v1762_v43  ;;  %v1795_v49 = vcombine.low %v1770_v44, %v1778_v45 }
 0x498   : > { %v1794_v50 = vrot.slane %v1780_v46, %v3106_v30  ;;  %v1810_v51 = vrot.slane %v1796_v47, %v3106_v30  ;;  %v1787_v52 = vrot.slane %v1779_v48, %v3106_v30  ;;  %v1803_v53 = vrot.slane %v1795_v49, %v3106_v30  ;;  %v2332_v30 = vld [vmem:[%s3302_s5] ss:$0 sm:$0xff] }
 0x49a   : > { %v1813_v54 = vcombine.low %v1794_v50, %v1810_v51  ;;  %v1812_v55 = vcombine.high %v1787_v52, %v1803_v53  ;;  %v1811_v56 = vcombine.low %v1787_v52, %v1803_v53  ;;  %v1814_v22 = vcombine.high %v1794_v50, %v1810_v51 }
 0x49c   : > { %1820 = vrot.lane.b32.xlu1 %v1813_v54, %s2815_s18  ;;  %1816 = vrot.lane.b32.xlu0 %v1812_v55, %s2816_s15  ;;  %s2344_s15 = sshll.u32 %s2905_s25, 7  ;;  %s2727_s25 = scalar_lea.vmem %s2726_s30, 256 }
 0x49d   : > { %s2170_s29 = scalar_lea.hbm %s3345_s2, %s2344_s15 }
 0x4a0   : > { %1824 = vrot.lane.b32.xlu1 %v1814_v22, %s2817_s14  ;;  %v2341_v22 = vld [vmem:[%s3307_s10] ss:$0 sm:$0xff]  ;;  %s508_s14 = scalar_lea.vmem [#allocation11], %s3047_s21 }
 0x4a1   : > { %s2172_s20 = sshll.u32 %s508_s14, 4  ;;  %s2173_s20 = int_to_ptr.vmem [resolvable:$true] %s2172_s20 }
 0x4a2   : > { %s2721_s27 = scalar_lea.vmem %s2173_s20, 128  ;;  %p2728_p7 = scmp.lt.s32.totalorder %s2173_s20, %s2726_s30 }
 0x4a3   : > { %p2722_p12 = scmp.ne.s32.totalorder %s2173_s20, %s2721_s27  ;;  %p2729_p9 = scmp.lt.s32.totalorder %s2727_s25, %s2721_s27 }
 0x4a5   : > { %p2723_p5 = pnand %p2722_p12, %p3346_p0  ;;  %p2730_p13 = por %p2729_p9, %p2728_p7 }
 0x4a7   : > { %p2724_p3 = pneg %p2723_p5 }
 0x4a9   : > { %p2731_p8 = pnand %p2730_p13, %p2724_p3 }
 0x50e   : > { %v1821_v57 = vpop.permute.xlu1 %1820  ;;  %v1817_v58 = vpop.permute.xlu0 %1816 }
 0x50f   : > { %v1827_v59 = vsel %vm1038_vm2, %v1811_v56, %v1817_v58  ;;  %v2342_v58 = vld [vmem:[%s3308_s11] ss:$0 sm:$0xff] }
 0x510   : > { %v1829_v61 = vsel %vm1828_vm3, %v1827_v59, %v1821_v57 }
 0x512   : > { %v1825_v60 = vpop.permute.xlu1 %1824 }
 0x513   : > { %v1831_v62 = vsel %vm1830_vm4, %v1829_v61, %v1825_v60 }
 0x514   : > { %2443 = vmatmul.mubr.msk.f32.vlgmr.msra.gmra.mxu0 %vm521_vm1, %v1831_v62 }
 0x515   : > { %2464 = vmatprep.mubr.msk.f32.mxu0 %vm2807_vm0, %v2806_v0  ;;  %2457 = vmatpush3.msra.mxu0 %v2040_v24 }
 0x516   : > { %2458 = vmatprep.subr.mxu0 %v2806_v0 }
 0x517   : > { %2459 = vmatpush3.msra.mxu0 %v2039_v25 }
 0x518   : > { %2460 = vmatprep.subr.mxu0 %v2806_v0 }
 0x519   : > { %2461 = vmatpush3.msra.mxu0 %v2038_v26 }
 0x51a   : > { %2462 = vmatprep.subr.mxu0 %v2806_v0  ;;  %v2339_v0 = vld [vmem:[%s3306_s9 + $0x1] ss:$0 sm:$0xff] }
 0x51b   : > { %2463 = vmatpush3.msra.mxu0 %v2037_v27 }
 0x5d4   : > { %v1912_v63 = vpop.f32.mrf.mxu0 }
 0x5d5   : > { %v1913_v1 = vadd.f32 %v2332_v30, %v1912_v63 }
 0x5d6   : > { %v2444_v2 = vpop.f32.mrf.mxu0 }
 0x5d7   : > { %v1916_v3 = vadd.f32 %v1913_v1, %v3077_v5  ;;  %v1947_v5 = vld [vmem:[#allocation10] sm:$0xff] }
 0x5d8   : > { %2452 = vmatpush3.msra.mxu1 %v1947_v5 }
 0x5d9   : > { %v1919_v4 = vsel %vm521_vm1, %v1916_v3, 0.0 }
 0x5da   : > { %1920 = vadd.xlane.f32.xlu0 %v1919_v4 }
 0x663   : > { %v1921_v6 = vpop.xlane.xlu0 %1920 }
 0x664   : > { %v1923_v7 = vmul.f32 0.03125, %v1921_v6 }
 0x666   : > { %v1924_v8 = vsub.f32 %v1916_v3, %v1923_v7 }
 0x668   : > { %v1925_v12 = vmul.f32 %v1924_v8, %v1924_v8 }
 0x66a   : > { %v1926_v9 = vsel %vm521_vm1, %v1925_v12, 0.0 }
 0x66b   : > { %1927 = vadd.xlane.f32.xlu1 %v1926_v9 }
 0x6f4   : > { %v1928_v14 = vpop.xlane.xlu1 %1927 }
 0x6f5   : > { %v1929_v15 = vmul.f32 0.03125, %v1928_v14 }
 0x6f7   : > { %v1930_v16 = vadd.f32 1e-05, %v1929_v15 }
 0x6f9   : > { %2579 = vrsqrt.f32 %v1930_v16 }
 0x706   : > { %v2580_v17 = vpop.eup %2579 }
 0x707   : > { %v1932_v19 = vmul.f32 %v2580_v17, %v1924_v8 }
 0x709   : > { %v1939_v21 = vmul.f32 %v2334_v18, %v1932_v19 }
 0x70b   : > { %v1946_v23 = vadd.f32 %v2335_v20, %v1939_v21 }
 0x70d   : > { %2454 = vmatmul.mubr.msk.f32.vlgmr.msra.gmra.mxu1 %vm521_vm1, %v1946_v23 }
 0x7cd   : > { %v2027_v29 = vpop.f32.mrf.mxu1 }
 0x7ce   : > { %v2028_v31 = vadd.f32 %v2336_v28, %v2027_v29 }
 0x7cf   : > { %v2455_v32 = vpop.f32.mrf.mxu1 }
 0x7d0   : > { %v2032_v33 = vmul.f32 0.70710677, %v2028_v31  ;;  %v2031_v35 = vmul.f32 0.5, %v2028_v31 }
 0x7d2   : > { %2581 = verf.f32 %v2032_v33 }
 0x7df   : > { %v2582_v34 = vpop.eup %2581 }
 0x7e0   : > { %v2034_v36 = vadd.f32 1.0, %v2582_v34 }
 0x7e2   : > { %v2035_v37 = vmul.f32 %v2034_v36, %v2031_v35 }
 0x7e4   : > { %2465 = vmatmul.mubr.msk.f32.vlgmr.msra.gmra.mxu0 %vm521_vm1, %v2035_v37 }
 0x8a4   : > { %v2118_v38 = vpop.f32.mrf.mxu0 }
 0x8a5   : > { %v2119_v39 = vadd.f32 %v2339_v0, %v2118_v38 }
 0x8a6   : > { %v2466_v40 = vpop.f32.mrf.mxu0 }
 0x8a7   : > { %v2123_v41 = vmul.f32 0.70710677, %v2119_v39  ;;  %v2122_v43 = vmul.f32 0.5, %v2119_v39 }
 0x8a9   : > { %2583 = verf.f32 %v2123_v41 }
 0x8b6   : > { %v2584_v42 = vpop.eup %2583 }
 0x8b7   : > { %v2125_v44 = vadd.f32 1.0, %v2584_v42 }
 0x8b9   : > { %v2126_v45 = vmul.f32 %v2125_v44, %v2122_v43 }
 0x8bb   : > { %v2127_v46 = vadd.f32 %v2126_v45, %v1946_v23 }
 0x8bd   : > { %v2130_v47 = vsel %vm521_vm1, %v2127_v46, 0.0 }
 0x8be   : > { %2131 = vadd.xlane.f32.xlu0 %v2130_v47 }
 0x947   : > { %v2132_v48 = vpop.xlane.xlu0 %2131 }
 0x948   : > { %v2133_v49 = vmul.f32 0.03125, %v2132_v48 }
 0x94a   : > { %v2134_v50 = vsub.f32 %v2127_v46, %v2133_v49 }
 0x94c   : > { %v2135_v51 = vmul.f32 %v2134_v50, %v2134_v50 }
 0x94e   : > { %v2136_v52 = vsel %vm521_vm1, %v2135_v51, 0.0 }
 0x94f   : > { %2137 = vadd.xlane.f32.xlu0 %v2136_v52 }
 0x9d8   : > { %v2138_v53 = vpop.xlane.xlu0 %2137 }
 0x9d9   : > { %v2139_v54 = vmul.f32 0.03125, %v2138_v53 }
 0x9db   : > { %v2140_v55 = vadd.f32 1e-05, %v2139_v54 }
 0x9dd   : > { %2585 = vrsqrt.f32 %v2140_v55 }
 0x9ea   : > { %v2586_v56 = vpop.eup %2585 }
 0x9eb   : > { %v2142_v57 = vmul.f32 %v2586_v56, %v2134_v50 }
 0x9ed   : > { %v2149_v59 = vmul.f32 %v2341_v22, %v2142_v57 }
 0x9ef   : > { %v2156_v60 = vadd.f32 %v2342_v58, %v2149_v59 }
 0x9f1   : > { %2157 = vst.msk [vmem:[%s508_s14] sm:$0xff] %vm521_vm1, %v2156_v60 }
 0x9f2   : > { %2734 = shalt.err (!%p2731_p8)
}
 0x9f3   : > { %s2735_s21 = scalar_lea.hbm %s2170_s29, 128  ;;  %s2739_s8 = scalar_lea.hbm %s3345_s2, 256 }
 0x9f4   : > { %p2736_p10 = scmp.ne.s32.totalorder %s2170_s29, %s2735_s21  ;;  %p2740_p2 = scmp.lt.s32.totalorder %s2170_s29, %s3345_s2 }
 0x9f5   : > { %p2741_p4 = scmp.lt.s32.totalorder %s2739_s8, %s2735_s21 }
 0x9f6   : > { %p2737_p1 = pnand %p2736_p10, %p3346_p0 }
 0x9f7   : > { %p2742_p6 = por %p2741_p4, %p2740_p2 }
 0x9f8   : > { %p2738_p11 = pneg %p2737_p1 }
 0x9fa   : > { %p2743_p12 = pnand %p2742_p6, %p2738_p11 }
 0x9fc   : > { %2746 = shalt.err (!%p2743_p12)
}
 0x9fd   : > { %2483 = dma.vmem_to_hbm [thread:$0]  (%p3346_p0), %s2173_s20, 128, %s2170_s29, %s2159_s17  }
 0x9fe PF: > { %s3347_s18 = sld [smem:[#allocation17_spill]]  ;;  %p3350_p3 = scmp.ge.s32.totalorder %s2797_s24, 2 }
 0x9ff   : > { %s3348_s15 = sld [smem:[#allocation19_spill]] }
 0xa04   : > { %s2184_s14 = sand.u32 1, %s3347_s18  }
 0xa05   : > { %p3349_p5 = scmp.ne.s32.totalorder %s3348_s15, 0  ;;  %s2185_s26 = scalar_lea.sflag [#allocation4], %s2184_s14 }
 0xa07   : > { %p2503_p7 = pnand %p3350_p3, %p3349_p5 }
 0xa09   : > { %p2504_p9 = pneg %p2503_p7 }
 0xa0b   : > { %2780 = dma.done.wait (%p2504_p9), %s2185_s26, 128  }
 0xa0c   : > { %2782 = vsyncadd (%p2504_p9), %s2185_s26, 4294967168  ;;  %s3351_s24 = sld [smem:[#allocation20_spill]]  ;;  %s3354_s21 = smov %s2789_s22 }
 0xa0d   : > { %s3352_s16 = sld [smem:[#allocation18_spill]] }
 0xa0e   : > { %s3353_s23 = sld [smem:[#allocation21_spill]] }
 0xa12   : > { %p29_p13 = scmp.ge.s32.totalorder %s3351_s24, 4  }
 0xa13   : > { %s3355_s22 = smov %s3352_s16 }
 0xa14   :  { %31 = sbr.rel (!%p29_p13) target bundleno = 13 (0xd), region = 140 }
 0xa19   :  { %2190 = vsyncpa [#allocation3], 1 }
 0xa1a   :  { %2192 = vsyncpa [#allocation3 + $0x1], 1 }
 0xa1b   :  { %2193 = vsyncpa [#allocation6], 1 }
 0xa1c   :  { %2195 = vsyncpa [#allocation6 + $0x1], 1 }
 0xa1d   :  { %2196 = vsyncpa [#allocation9], 1 }
 0xa1e   :  { %2197 = vsyncpa [#allocation4], 1 }
 0xa1f   :  { %2199 = vsyncpa [#allocation4 + $0x1], 1 }

</bundles_post_ra>
